<compile_context>
chip_gen: v7x
topology: tpu7x:2x2x1
jax: 0.10.0
libtpu: 0.0.40
codegen_flags: <defaults>
</compile_context>

<pallas_src>
import functools

import jax
import jax.numpy as jnp
from jax import lax
from jax.experimental import pallas as pl
from jax.experimental.pallas import tpu as pltpu


def _round_up(v, m):
    return ((v + m - 1) // m) * m


def _classifier_kernel(scales_ref, x_ref, v1_ref, b1_ref, v2_ref, b2_ref, o_ref):
    # Precomputed weight_norm scales (g * rsqrt(||V||_F^2)) live in SMEM via
    # scalar prefetch -- no per-step cross-lane reduce / sqrt / divide.
    s1 = scales_ref[0]
    s2 = scales_ref[1]

    # ---- Layer 1: weight_norm(dim=None) Linear + ReLU ------------------------
    # (B, in) contracted with (hid, in) on the last axes -> (B, hid); no transpose.
    h = lax.dot_general(
        x_ref[...], v1_ref[...],
        dimension_numbers=(((1,), (1,)), ((), ())),
        preferred_element_type=jnp.float32,
    )
    # (x @ V1^T) * s1 == x @ (s1 * V1)^T ; bias + ReLU on the f32 accumulator.
    h = jnp.maximum(h * s1 + b1_ref[...], 0.0)
    # Dropout is identity at inference time.
    # TODO(synk): training-mode dropout (random mask) not implemented.

    # ---- Layer 2: weight_norm(dim=None) Linear (lane-padded output) ----------
    v2 = v2_ref[...]                                   # (out_pad, hid); zero rows beyond out_dim
    logits = lax.dot_general(
        h.astype(v2.dtype), v2,
        dimension_numbers=(((1,), (1,)), ((), ())),
        preferred_element_type=jnp.float32,
    )
    # Full-lane (128-multiple) unmasked store.
    o_ref[...] = (logits * s2 + b2_ref[...]).astype(o_ref.dtype)


@functools.partial(jax.jit, static_argnames=("block_b", "return_padded"))
def simple_classifier(x, v1, g1, b1, v2, g2, b2, *, block_b=1024, return_padded=False):
    """Forward pass of SimpleClassifier.

    x:  (B, in_dim)
    v1: (hid_dim, in_dim)   weight_norm direction tensor, layer 1
    g1: scalar              weight_norm magnitude (dim=None), layer 1
    b1: (hid_dim,)
    v2: (out_dim, hid_dim)  weight_norm direction tensor, layer 2
    g2: scalar              weight_norm magnitude (dim=None), layer 2
    b2: (out_dim,)
    returns logits (B, out_dim)   [or the lane-padded (B, out_pad) slab if
                                   return_padded=True, so a fused consumer can
                                   skip the post-call lane slice]
    """
    B, in_dim = x.shape
    hid_dim, _ = v1.shape
    out_dim, _ = v2.shape
    dtype = x.dtype

    # Lane-dense output: pad out_dim up to a multiple of 128 lanes.
    out_pad = max(128, _round_up(out_dim, 128))

    # ---- Batch tile selection ------------------------------------------------
    cap = max(8, (int(block_b) // 8) * 8)
    if B <= 8:
        bm = B                                   # full-extent block (any alignment)
    elif B <= 512:
        bm = min(B if B % 8 == 0 else (B // 8) * 8, cap)   # ragged last tile if unaligned
    else:
        # Keep >= 2 grid steps so the "parallel" batch axis shards across both
        # TensorCores on v7x; 512-row granularity keeps tiles near HBM roofline.
        half = _round_up(-(-B // 2), 512)
        bm = max(8, (min(cap, half) // 8) * 8)
    grid_b = pl.cdiv(B, bm)

    # Zero-padding V2 rows / b2 does not change the first out_dim logits
    # (and the Frobenius norm is computed from the unpadded V2 anyway).
    v2_p = v2 if out_pad == out_dim else jnp.pad(v2, ((0, out_pad - out_dim), (0, 0)))
    b2_p = b2 if out_pad == out_dim else jnp.pad(b2, (0, out_pad - out_dim))

    b1_2d = b1.reshape(1, hid_dim).astype(jnp.float32)
    b2_2d = b2_p.reshape(1, out_pad).astype(jnp.float32)

    # Once-per-call weight_norm scales (g * rsqrt(sum(V^2))) -> scalar-prefetch SMEM.
    s1 = jnp.asarray(g1, jnp.float32) * lax.rsqrt(
        jnp.sum(jnp.square(v1.astype(jnp.float32))))
    s2 = jnp.asarray(g2, jnp.float32) * lax.rsqrt(
        jnp.sum(jnp.square(v2.astype(jnp.float32))))
    scales = jnp.stack([s1, s2])

    # ---- VMEM budget & cost hint ----------------------------------------------
    elt = jnp.dtype(dtype).itemsize
    w_elt = jnp.dtype(v1.dtype).itemsize
    w_bytes = (hid_dim * in_dim + out_pad * hid_dim) * w_elt + (hid_dim + out_pad) * 4
    act_bytes = 2 * bm * (in_dim + out_pad) * elt        # double-buffered x / out tiles
    vmem_limit = int(min(64 << 20, max(16 << 20, 2 * (w_bytes + act_bytes))))

    flops = 2 * B * (in_dim * hid_dim + hid_dim * out_pad) + 4 * B * (hid_dim + out_pad)
    bytes_accessed = B * (in_dim + out_pad) * elt + w_bytes

    out = pl.pallas_call(
        _classifier_kernel,
        out_shape=jax.ShapeDtypeStruct((B, out_pad), dtype),
        grid_spec=pltpu.PrefetchScalarGridSpec(
            num_scalar_prefetch=1,
            grid=(grid_b,),
            in_specs=[
                # x tile advances with the batch grid axis (ragged last tile OK).
                pl.BlockSpec((bm, in_dim), lambda i, scales: (i, 0)),
                # Weights / biases stay VMEM-resident (constant block index).
                pl.BlockSpec((hid_dim, in_dim), lambda i, scales: (0, 0)),
                pl.BlockSpec((1, hid_dim), lambda i, scales: (0, 0)),
                pl.BlockSpec((out_pad, hid_dim), lambda i, scales: (0, 0)),
                pl.BlockSpec((1, out_pad), lambda i, scales: (0, 0)),
            ],
            out_specs=pl.BlockSpec((bm, out_pad), lambda i, scales: (i, 0)),
        ),
        compiler_params=pltpu.CompilerParams(
            dimension_semantics=("parallel",),
            vmem_limit_bytes=vmem_limit,
        ),
        cost_estimate=pl.CostEstimate(
            flops=flops, transcendentals=0, bytes_accessed=bytes_accessed),
    )(scales, x, v1, b1_2d, v2_p, b2_2d)

    if return_padded:
        return out                       # (B, out_pad) lane-padded slab, no extra copy
    return out[:, :out_dim]


if __name__ == "__main__":
    # Small, module-consistent shapes: in_dim=32, hid_dim=64, out_dim=16, batch=8.
    B, in_dim, hid_dim, out_dim = 8, 32, 64, 16

    key = jax.random.PRNGKey(0)
    kx, kv1, kg1, kb1, kv2, kg2, kb2 = jax.random.split(key, 7)

    x = jax.random.normal(kx, (B, in_dim), dtype=jnp.float32)

    # Deterministic parameter init (shapes match nn.Linear + weight_norm(dim=None)).
    v1 = jax.random.normal(kv1, (hid_dim, in_dim), dtype=jnp.float32) * 0.1
    g1 = jnp.float32(1.0) + 0.1 * jax.random.normal(kg1, (), dtype=jnp.float32)
    b1 = jax.random.normal(kb1, (hid_dim,), dtype=jnp.float32) * 0.01
    v2 = jax.random.normal(kv2, (out_dim, hid_dim), dtype=jnp.float32) * 0.1
    g2 = jnp.float32(1.0) + 0.1 * jax.random.normal(kg2, (), dtype=jnp.float32)
    b2 = jax.random.normal(kb2, (out_dim,), dtype=jnp.float32) * 0.01

    logits = simple_classifier(x, v1, g1, b1, v2, g2, b2)
    jax.block_until_ready(logits)

    # Pure-JAX reference (weight_norm with dim=None -> scalar Frobenius gain).
    w1_eff = (g1 / jnp.sqrt(jnp.sum(v1 ** 2))) * v1
    w2_eff = (g2 / jnp.sqrt(jnp.sum(v2 ** 2))) * v2
    ref = jnp.maximum(x @ w1_eff.T + b1, 0.0) @ w2_eff.T + b2

    assert logits.shape == (B, out_dim)
    assert jnp.allclose(logits, ref, atol=1e-4, rtol=1e-4), "mismatch vs reference"

    print("KERNEL_OK")
</pallas_src>

<mosaic_0001>
module attributes {stable_mosaic.version = 11 : i64} {
  func.func @_classifier_kernel(%arg0: i32, %arg1: memref<2xf32, #tpu.memory_space<smem>>, %arg2: memref<8x32xf32, #tpu.memory_space<vmem>>, %arg3: memref<64x32xf32, #tpu.memory_space<vmem>>, %arg4: memref<1x64xf32, #tpu.memory_space<vmem>>, %arg5: memref<128x64xf32, #tpu.memory_space<vmem>>, %arg6: memref<1x128xf32, #tpu.memory_space<vmem>>, %arg7: memref<8x128xf32, #tpu.memory_space<vmem>>) attributes {dimension_semantics = [#tpu.dimension_semantics<parallel>], iteration_bounds = array<i64: 1>, scalar_prefetch = 1 : i64, scratch_operands = 0 : i64, tpu.core_type = #tpu.core_type<tc>, window_params = [{transform_indices = @transform_0, window_bounds = array<i64: 8, 32>}, {pipeline_mode = #tpu.pipeline_mode<synchronous>, transform_indices = @transform_1, window_bounds = array<i64: 64, 32>}, {pipeline_mode = #tpu.pipeline_mode<synchronous>, transform_indices = @transform_2, window_bounds = array<i64: 1, 64>}, {pipeline_mode = #tpu.pipeline_mode<synchronous>, transform_indices = @transform_3, window_bounds = array<i64: 128, 64>}, {pipeline_mode = #tpu.pipeline_mode<synchronous>, transform_indices = @transform_4, window_bounds = array<i64: 1, 128>}, {transform_indices = @transform_5, window_bounds = array<i64: 8, 128>}]} {
    %c0 = arith.constant 0 : index
    %0 = memref.load %arg1[%c0] : memref<2xf32, #tpu.memory_space<smem>>
    %c1 = arith.constant 1 : index
    %1 = memref.load %arg1[%c1] : memref<2xf32, #tpu.memory_space<smem>>
    %c0_0 = arith.constant 0 : index
    %c0_1 = arith.constant 0 : index
    %2 = vector.load %arg2[%c0_0, %c0_1] : memref<8x32xf32, #tpu.memory_space<vmem>>, vector<8x32xf32>
    %c0_2 = arith.constant 0 : index
    %c0_3 = arith.constant 0 : index
    %3 = vector.load %arg3[%c0_2, %c0_3] : memref<64x32xf32, #tpu.memory_space<vmem>>, vector<64x32xf32>
    %cst = arith.constant dense<0.000000e+00> : vector<8x64xf32>
    %4 = tpu.matmul %2, %3, %cst {dimension_numbers = #tpu.dot_dimension_numbers<[1], [1], [0], [0], [0, 0, 1, 0], [], []>} : vector<8x32xf32>, vector<64x32xf32>, vector<8x64xf32> -> vector<8x64xf32>
    %5 = vector.broadcast %0 : f32 to vector<8x64xf32>
    %6 = arith.mulf %4, %5 : vector<8x64xf32>
    %c0_4 = arith.constant 0 : index
    %c0_5 = arith.constant 0 : index
    %7 = vector.load %arg4[%c0_4, %c0_5] : memref<1x64xf32, #tpu.memory_space<vmem>>, vector<1x64xf32>
    %8 = vector.broadcast %7 : vector<1x64xf32> to vector<8x64xf32>
    %9 = arith.addf %6, %8 : vector<8x64xf32>
    %cst_6 = arith.constant 0.000000e+00 : f32
    %10 = vector.broadcast %cst_6 : f32 to vector<8x64xf32>
    %11 = arith.maximumf %9, %10 : vector<8x64xf32>
    %c0_7 = arith.constant 0 : index
    %c0_8 = arith.constant 0 : index
    %12 = vector.load %arg5[%c0_7, %c0_8] : memref<128x64xf32, #tpu.memory_space<vmem>>, vector<128x64xf32>
    %cst_9 = arith.constant dense<0.000000e+00> : vector<8x128xf32>
    %13 = tpu.matmul %11, %12, %cst_9 {dimension_numbers = #tpu.dot_dimension_numbers<[1], [1], [0], [0], [0, 0, 1, 0], [], []>} : vector<8x64xf32>, vector<128x64xf32>, vector<8x128xf32> -> vector<8x128xf32>
    %14 = vector.broadcast %1 : f32 to vector<8x128xf32>
    %15 = arith.mulf %13, %14 : vector<8x128xf32>
    %c0_10 = arith.constant 0 : index
    %c0_11 = arith.constant 0 : index
    %16 = vector.load %arg6[%c0_10, %c0_11] : memref<1x128xf32, #tpu.memory_space<vmem>>, vector<1x128xf32>
    %17 = vector.broadcast %16 : vector<1x128xf32> to vector<8x128xf32>
    %18 = arith.addf %15, %17 : vector<8x128xf32>
    %c0_12 = arith.constant 0 : index
    %c0_13 = arith.constant 0 : index
    %19 = vector.load %arg7[%c0_12, %c0_13] : memref<8x128xf32, #tpu.memory_space<vmem>>, vector<8x128xf32>
    tpu.vector_store %arg7[%c0_12, %c0_13], %18 {strides = array<i32>} : memref<8x128xf32, #tpu.memory_space<vmem>>, vector<8x128xf32>,
    return
  }
  func.func @transform_0(%arg0: i32, %arg1: memref<2xf32, #tpu.memory_space<smem>>) -> (i32, i32) {
    %c0_i32 = arith.constant 0 : i32
    %c0_i32_0 = arith.constant 0 : i32
    return %arg0, %c0_i32 : i32, i32
  }
  func.func @transform_1(%arg0: i32, %arg1: memref<2xf32, #tpu.memory_space<smem>>) -> (i32, i32) {
    %c0_i32 = arith.constant 0 : i32
    %c0_i32_0 = arith.constant 0 : i32
    %c0_i32_1 = arith.constant 0 : i32
    return %c0_i32, %c0_i32_0 : i32, i32
  }
  func.func @transform_2(%arg0: i32, %arg1: memref<2xf32, #tpu.memory_space<smem>>) -> (i32, i32) {
    %c0_i32 = arith.constant 0 : i32
    %c0_i32_0 = arith.constant 0 : i32
    %c0_i32_1 = arith.constant 0 : i32
    return %c0_i32, %c0_i32_0 : i32, i32
  }
  func.func @transform_3(%arg0: i32, %arg1: memref<2xf32, #tpu.memory_space<smem>>) -> (i32, i32) {
    %c0_i32 = arith.constant 0 : i32
    %c0_i32_0 = arith.constant 0 : i32
    %c0_i32_1 = arith.constant 0 : i32
    return %c0_i32, %c0_i32_0 : i32, i32
  }
  func.func @transform_4(%arg0: i32, %arg1: memref<2xf32, #tpu.memory_space<smem>>) -> (i32, i32) {
    %c0_i32 = arith.constant 0 : i32
    %c0_i32_0 = arith.constant 0 : i32
    %c0_i32_1 = arith.constant 0 : i32
    return %c0_i32, %c0_i32_0 : i32, i32
  }
  func.func @transform_5(%arg0: i32, %arg1: memref<2xf32, #tpu.memory_space<smem>>) -> (i32, i32) {
    %c0_i32 = arith.constant 0 : i32
    %c0_i32_0 = arith.constant 0 : i32
    return %arg0, %c0_i32 : i32, i32
  }
}

</mosaic_0001>

<bundles_post_ra>
// kernel: simple_classifier.1
= control target key start
LH: loop header
LB: loop body
LE: loop exit
PB: predicated region body
PF: predicated region fallthrough
CT: control target
= control target key end

     0   :  { %s697_s0 = inlined_call_operand.vmem [shape: f32[2], index: 0, kind: input, shape index: {}]   ;;  %s698_s1 = inlined_call_operand.vmem [shape: f32[8,32], index: 1, kind: input, shape index: {}]   ;;  %s699_s2 = inlined_call_operand.vmem [shape: f32[64,32], index: 2, kind: input, shape index: {}]   ;;  %s700_s3 = inlined_call_operand.vmem [shape: f32[1,64], index: 3, kind: input, shape index: {}]   ;;  %s701_s4 = inlined_call_operand.vmem [shape: f32[128,64], index: 4, kind: input, shape index: {}]   ;;  %s702_s5 = inlined_call_operand.vmem [shape: f32[1,128], index: 5, kind: input, shape index: {}]   ;;  %s703_s6 = inlined_call_operand.hbm [shape: f32[8,128], index: 6, kind: output, shape index: {}]  }
   0x1   :  { %s11_s23 = sshll.u32 %s697_s0, 4  ;;  %s12_s23 = int_to_ptr.vmem [resolvable:$true] %s11_s23 }
   0x2   :  { %s473_s24 = scalar_lea.vmem %s12_s23, 16  ;;  %p478_p1 = scmp.lt.s32.totalorder %s12_s23, %s12_s23 }
   0x3   :  { %p474_p0 = scmp.ne.s32.totalorder %s12_s23, %s473_s24  ;;  %p479_p2 = scmp.lt.s32.totalorder %s473_s24, %s473_s24 }
   0x5   :  { %p480_p3 = por %p479_p2, %p478_p1 }
   0x7   :  { %p481_p4 = pnand %p480_p3, %p474_p0 }
   0x9   :  { %484 = shalt.err (!%p481_p4)  }
   0xa   :  { %s511_s25 = smov [#allocation3]  }
   0xb   :  { %14 = dma.vmem_to_smem %s12_s23, 16, %s511_s25, [#allocation2] }
   0xc   :  { %507 = dma.done.wait [#allocation2], 16 }
   0xd   :  { %508 = vsyncadd [#allocation2], 4294967280 }
   0xe   :  { %16 = sfence }
   0xf   :  { %v31_v0 = vld [vmem:[%s699_s2] sm:$0xff]  ;;  %v32_v1 = vld [vmem:[%s699_s2 + $0x8] sm:$0xff]  ;;  %vm39_vm0 = vcmask 261120   ;;  %v512_v2 = vmov 0.0|0.0   ;;  %vm164_vm2 = vcmask 523264   ;;  %vm513_vm3 = vmmov 0  }
  0x10   :  { %420 = vmatprep.subr.bf16.mxu0 %v512_v2  ;;  %v421_v3 = vpack.c.bf16 %v32_v1, %v31_v0  ;;  %vm563_vm1 = vmpackc.low %vm39_vm0, %vm39_vm0  ;;  %436 = vmatprep.subr.bf16.mxu1 %v512_v2  ;;  %v514_v5 = vmov 0.0   ;;  %v148_v6 = vld [vmem:[%s701_s4] sm:$0xff]  ;;  %v149_v7 = vld [vmem:[%s701_s4 + $0x8] sm:$0xff] }
  0x11   :  { %382 = vmatprep.mubr.msk.f32.mxu0 %vm513_vm3, %v514_v5  ;;  %417 = vmatprep.mubr.msk.f32.mxu1 %vm513_vm3, %v514_v5  ;;  %v33_v8 = vld [vmem:[%s699_s2 + $0x10] sm:$0xff]  ;;  %v34_v9 = vld [vmem:[%s699_s2 + $0x18] sm:$0xff]  ;;  %v437_v10 = vpack.c.bf16 %v149_v7, %v148_v6  ;;  %vm585_vm4 = vmpackc.low %vm164_vm2, %vm164_vm2 }
  0x12   :  { %423 = vmatpush3.bf16.xpose.msk.msra.mxu0 %vm563_vm1, %v421_v3  ;;  %v425_v12 = vpack.c.bf16 %v34_v9, %v33_v8  ;;  %v150_v13 = vld [vmem:[%s701_s4 + $0x10] sm:$0xff]  ;;  %v151_v14 = vld [vmem:[%s701_s4 + $0x18] sm:$0xff] }
  0x13   :  { %424 = vmatprep.subr.bf16.mxu0 %v512_v2  ;;  %439 = vmatpush3.bf16.xpose.msk.msra.mxu1 %vm585_vm4, %v437_v10 }
  0x14   :  { %440 = vmatprep.subr.bf16.mxu1 %v512_v2 }
  0x15   :  { %17 = vsyncpa [#allocation5], 0  ;;  %v441_v15 = vpack.c.bf16 %v151_v14, %v150_v13  ;;  %v35_v16 = vld [vmem:[%s699_s2 + $0x20] sm:$0xff]  ;;  %v36_v17 = vld [vmem:[%s699_s2 + $0x28] sm:$0xff]  ;;  %s28_s24 = sld [smem:[#allocation3]]  ;;  %s311_s27 = sld [smem:[#allocation3 + $0x1]] }
  0x16   :  { %v429_v18 = vpack.c.bf16 %v36_v17, %v35_v16  ;;  %v152_v19 = vld [vmem:[%s701_s4 + $0x20] sm:$0xff]  ;;  %v153_v20 = vld [vmem:[%s701_s4 + $0x28] sm:$0xff]  ;;  %v37_v22 = vld [vmem:[%s699_s2 + $0x30] sm:$0xff]  ;;  %s515_s29 = smov [#allocation4]  }
  0x17   :  { %v445_v21 = vpack.c.bf16 %v153_v20, %v152_v19  ;;  %v38_v23 = vld [vmem:[%s699_s2 + $0x38] sm:$0xff]  ;;  %v154_v25 = vld [vmem:[%s701_s4 + $0x30] sm:$0xff]  ;;  %v30_v28 = vld [vmem:[%s698_s1] sm:$0xff]  ;;  %s303_s0 = sshll.u32 %s515_s29, 4  ;;  %s304_s0 = int_to_ptr.vmem [resolvable:$true] %s303_s0 }
  0x18   :  { %v433_v24 = vpack.c.bf16 %v38_v23, %v37_v22  ;;  %v155_v26 = vld [vmem:[%s701_s4 + $0x38] sm:$0xff]  ;;  %v156_v29 = vld [vmem:[%s701_s4 + $0x40] sm:$0xff]  ;;  %v157_v30 = vld [vmem:[%s701_s4 + $0x48] sm:$0xff]  ;;  %p490_p6 = scmp.lt.s32.totalorder %s304_s0, %s304_s0 }
  0x19   :  { %v449_v27 = vpack.c.bf16 %v155_v26, %v154_v25  ;;  %v453_v31 = vpack.c.bf16 %v157_v30, %v156_v29  ;;  %v158_v32 = vld [vmem:[%s701_s4 + $0x50] sm:$0xff]  ;;  %v159_v33 = vld [vmem:[%s701_s4 + $0x58] sm:$0xff]  ;;  %v160_v35 = vld [vmem:[%s701_s4 + $0x60] sm:$0xff] }
  0x1a   :  { %427 = vmatpush3.bf16.xpose.msk.msra.mxu0 %vm563_vm1, %v425_v12  ;;  %v457_v34 = vpack.c.bf16 %v159_v33, %v158_v32  ;;  %v161_v36 = vld [vmem:[%s701_s4 + $0x68] sm:$0xff]  ;;  %v162_v38 = vld [vmem:[%s701_s4 + $0x70] sm:$0xff]  ;;  %v163_v39 = vld [vmem:[%s701_s4 + $0x78] sm:$0xff] }
  0x1b   :  { %428 = vmatprep.subr.bf16.mxu0 %v512_v2  ;;  %443 = vmatpush3.bf16.xpose.msk.msra.mxu1 %vm585_vm4, %v441_v15  ;;  %v461_v37 = vpack.c.bf16 %v161_v36, %v160_v35  ;;  %v465_v40 = vpack.c.bf16 %v163_v39, %v162_v38  ;;  %v137_v41 = vstv %s28_s24  ;;  %v321_v43 = vld [vmem:[%s700_s3] ss:$0 sm:$0xff]  ;;  %v286_v48 = vstv %s311_s27  ;;  %s485_s3 = scalar_lea.vmem %s304_s0, 128 }
  0x1c   :  { %444 = vmatprep.subr.bf16.mxu1 %v512_v2  ;;  %v339_v50 = vld [vmem:[%s702_s5] ss:$0 sm:$0xff]  ;;  %p486_p5 = scmp.ne.s32.totalorder %s304_s0, %s485_s3  ;;  %p491_p7 = scmp.lt.s32.totalorder %s485_s3, %s485_s3 }
  0x1e   :  { %p492_p8 = por %p491_p7, %p490_p6 }
  0x20   :  { %p493_p9 = pnand %p492_p8, %p486_p5 }
  0x22   :  { %431 = vmatpush3.bf16.xpose.msk.msra.mxu0 %vm563_vm1, %v429_v18 }
  0x23   :  { %432 = vmatprep.subr.bf16.mxu0 %v512_v2  ;;  %447 = vmatpush3.bf16.xpose.msk.msra.mxu1 %vm585_vm4, %v445_v21 }
  0x24   :  { %448 = vmatprep.subr.bf16.mxu1 %v512_v2 }
  0x2a   :  { %435 = vmatpush3.bf16.xpose.msk.msra.mxu0 %vm563_vm1, %v433_v24 }
  0x2b   :  { %451 = vmatpush3.bf16.xpose.msk.msra.mxu1 %vm585_vm4, %v449_v27 }
  0x2c   :  { %452 = vmatprep.subr.bf16.mxu1 %v512_v2 }
  0x31   :  { %383 = vmatmul.mubr.msk.f32.vlgmr.msra.gmra.mrb[0].mxu0 %vm39_vm0, %v30_v28 }
  0x33   :  { %455 = vmatpush3.bf16.xpose.msk.msra.mxu1 %vm585_vm4, %v453_v31 }
  0x34   :  { %456 = vmatprep.subr.bf16.mxu1 %v512_v2 }
  0x3b   :  { %459 = vmatpush3.bf16.xpose.msk.msra.mxu1 %vm585_vm4, %v457_v34 }
  0x3c   :  { %460 = vmatprep.subr.bf16.mxu1 %v512_v2 }
  0x43   :  { %463 = vmatpush3.bf16.xpose.msk.msra.mxu1 %vm585_vm4, %v461_v37 }
  0x44   :  { %464 = vmatprep.subr.bf16.mxu1 %v512_v2 }
  0x4b   :  { %467 = vmatpush3.bf16.xpose.msk.msra.mxu1 %vm585_vm4, %v465_v40 }
 0x104   :  { %v133_v42 = vpop.f32.mrb[0].mxu0 }
 0x105   :  { %v138_v44 = vmul.f32 %v137_v41, %v133_v42  ;;  %v384_v45 = vpop.f32.mrb[1].mxu0 }
 0x107   :  { %v146_v46 = vadd.f32 %v321_v43, %v138_v44 }
 0x109   :  { %v147_v47 = vmax.f32 %v146_v46, 0.0 }
 0x10b   :  { %418 = vmatmul.mubr.msk.f32.vlgmr.msra.gmra.mrb[0].mxu1 %vm164_vm2, %v147_v47 }
 0x1de   :  { %v282_v49 = vpop.f32.mrb[0].mxu1 }
 0x1df   :  { %v287_v51 = vmul.f32 %v286_v48, %v282_v49  ;;  %v419_v52 = vpop.f32.mrb[1].mxu1 }
 0x1e1   :  { %v295_v53 = vadd.f32 %v339_v50, %v287_v51 }
 0x1e3   :  { %296 = vst [vmem:[#allocation4] sm:$0xff] %v295_v53 }
 0x1e4   :  { %496 = shalt.err (!%p493_p9)
}
 0x1e5   :  { %s497_s2 = scalar_lea.hbm %s703_s6, 128 }
 0x1e6   :  { %p498_p10 = scmp.ne.s32.totalorder %s703_s6, %s497_s2  ;;  %p501_p11 = scmp.lt.u32.totalorder %s497_s2, %s703_s6 }
 0x1e8   :  { %p503_p12 = pnand %p501_p11, %p498_p10 }
 0x1ea   :  { %506 = shalt.err (!%p503_p12)
}
 0x1eb   :  { %306 = dma.vmem_to_hbm [thread:$0]  %s304_s0, 128, %s703_s6, [#allocation5]  }
 0x1ec   :  { %509 = dma.done.wait [#allocation5], 128  }
 0x1ed   :  { %510 = vsyncadd [#allocation5], 4294967168 }
 0x1ee   :  { %310 = vsyncpa [#allocation5], 1 }

</bundles_post_ra>
